<compile_context>
chip_gen: v7x
topology: tpu7x:2x2x1
jax: 0.10.0
libtpu: 0.0.40
codegen_flags: <defaults>
</compile_context>

<pallas_src>
import math
import functools

import jax
import jax.numpy as jnp
from jax.experimental import pallas as pl
from jax.experimental.pallas import tpu as pltpu

_MIB = 1024 * 1024

# MXU operand dtype for the big N x N matmuls (homophily gram products, graph
# message passing).  bf16 operands + f32 accumulation: f32 matmuls run as
# multi-pass bf16 on every TPU generation, so this is ~3-6x MXU cadence and
# halves operand VMEM footprint.  Small MLP / decoder / Student-t matmuls stay
# f32 for numerical parity with the PyTorch reference.
MXU_DTYPE = jnp.bfloat16


# -----------------------------------------------------------------------------
# VMEM budget / tiling helpers
# -----------------------------------------------------------------------------
def _vmem_limit_bytes():
    try:
        cap = pltpu.get_tpu_info().vmem_capacity_bytes
    except Exception:
        cap = 128 * _MIB
    if cap >= 128 * _MIB:          # v5e / v6e: 128 MiB physical -> use ~100 MiB
        return 100 * _MIB
    return max(32 * _MIB, int(cap * 3 // 4))   # v7x: 64 MiB -> ~48 MiB


_VMEM_LIMIT = _vmem_limit_bytes()


def _cparams(dims):
    return pltpu.CompilerParams(dimension_semantics=dims,
                                vmem_limit_bytes=_VMEM_LIMIT)


def _pick_row_tile(n, *, cap=256, multiple=8):
    """Largest multiple-of-`multiple` row tile dividing n, bounded by `cap`."""
    cap = max(multiple, min(int(cap), n))
    if n <= cap:
        return n
    t = (cap // multiple) * multiple
    while t >= multiple:
        if n % t == 0:
            return t
        t -= multiple
    # TODO(synk): pad the row dimension for awkward N instead of falling back
    # to a whole-array block (VMEM blow-up risk for large non-divisible N).
    return n


def _homo_row_cap(n, dx, da):
    """Row-tile cap for the homophily kernel derived from the VMEM budget.

    Live bytes per tile row: hx/ha f32 outputs (2 pipeline buffers each),
    S bf16 output (2 buffers), ~5 (tm, N) f32 temporaries in the top-k loop.
    """
    per_row = (2 * 2 * 4 + 2 * 2 + 5 * 4) * n            # ~40 B per (row,col)
    resident = 2 * 4 * (dx + da) * n + 4 * _MIB           # zxT/zaT + slack
    budget = max(_VMEM_LIMIT - resident, _MIB)
    return int(max(16, min(budget // max(per_row, 1), 1024)))


def _mp_row_cap(n, d):
    """Row-tile cap for one message-passing step (S bf16 row tile dominates)."""
    per_row = 2 * 2 * n + 6 * 4 * d                       # S x 2 bufs + f32 rows
    resident = 2 * 4 * n * d + 4 * _MIB                   # resident h + slack
    budget = max(_VMEM_LIMIT - resident, _MIB)
    return int(max(16, min(budget // max(per_row, 1), 2048)))


# -----------------------------------------------------------------------------
# Buffered(1) support probe (resident operands -> single pipeline buffer)
# -----------------------------------------------------------------------------
_BUFFERED1 = None


def _buffered1_ok():
    global _BUFFERED1
    if _BUFFERED1 is None:
        try:
            spec = pl.BlockSpec((8, 128), lambda i: (0, 0),
                                pipeline_mode=pl.Buffered(1))

            def _k(x_ref, o_ref):
                o_ref[...] = x_ref[...] + 1.0

            y = pl.pallas_call(
                _k, grid=(2,),
                in_specs=[spec],
                out_specs=pl.BlockSpec((8, 128), lambda i: (i, 0)),
                out_shape=jax.ShapeDtypeStruct((16, 128), jnp.float32),
            )(jnp.zeros((8, 128), jnp.float32))
            jax.block_until_ready(y)
            _BUFFERED1 = True
        except Exception:
            _BUFFERED1 = False
    return _BUFFERED1


def _resident_spec(shape):
    """BlockSpec for an operand whose block index never changes."""
    ndim = len(shape)
    index_map = lambda *_: (0,) * ndim
    if _buffered1_ok():
        return pl.BlockSpec(shape, index_map, pipeline_mode=pl.Buffered(1))
    return pl.BlockSpec(shape, index_map)


# -----------------------------------------------------------------------------
# small in-kernel math helpers
# -----------------------------------------------------------------------------
def _l2_rows(x):
    """F.normalize(x, p=2, dim=-1) via rsqrt (EUP slot)."""
    ss = jnp.sum(x * x, axis=-1, keepdims=True)
    return x * jax.lax.rsqrt(jnp.maximum(ss, 1e-24))


def _dot(a, b):
    """Plain (tm, K) x (K, N) matmul in f32 (small MLP-sized operands)."""
    return jnp.dot(a, b, preferred_element_type=jnp.float32)


def _dot_bf16(a, b):
    """Big matmul: bf16 MXU operands, f32 accumulation."""
    return jnp.dot(a.astype(MXU_DTYPE), b.astype(MXU_DTYPE),
                   preferred_element_type=jnp.float32)


# -----------------------------------------------------------------------------
# Kernel 1: fused multi-layer MLP (all layers in one kernel, weights resident)
# -----------------------------------------------------------------------------
def _mlp_kernel(*refs, activations, also_l2_norm):
    x_ref = refs[0]
    if also_l2_norm:
        out_ref, norm_ref = refs[-2], refs[-1]
        wb = refs[1:-2]
    else:
        out_ref = refs[-1]
        norm_ref = None
        wb = refs[1:-1]
    h = x_ref[...]
    for i, act in enumerate(activations):
        Wt = wb[2 * i][...]          # (in, out) — pre-transposed on the host
        b = wb[2 * i + 1][...]       # (1, out)
        h = _dot(h, Wt) + b
        if act == "tanh":
            h = jnp.tanh(h)
        elif act == "sigmoid":
            h = jax.nn.sigmoid(h)
    out_ref[...] = h
    if also_l2_norm:
        norm_ref[...] = _l2_rows(h)


def fused_mlp(layers, x, *, final_activation="none", also_l2_norm=False):
    """Whole MLP / LatentMappingLayer in one pallas_call (eval mode).

    `layers` is a list of (Wt, b) with Wt already (in, out) and b (1, out).
    """
    M, Din = x.shape
    acts = tuple(["tanh"] * (len(layers) - 1) + [final_activation])
    tm = _pick_row_tile(M, cap=512)
    in_specs = [pl.BlockSpec((tm, Din), lambda i: (i, 0))]
    args = [x.astype(jnp.float32)]
    for (Wt, b) in layers:
        in_specs.append(_resident_spec(Wt.shape))
        in_specs.append(_resident_spec(b.shape))
        args.append(Wt)
        args.append(b)
    Dout = layers[-1][0].shape[1]
    # TODO(synk): lane-pad Dout to a multiple of 128 for unmasked stores; at
    # these widths the (N, Dout) stream is negligible vs the N^2 kernels.
    row_spec = pl.BlockSpec((tm, Dout), lambda i: (i, 0))
    row_shape = jax.ShapeDtypeStruct((M, Dout), jnp.float32)
    if also_l2_norm:
        out_specs = (row_spec, pl.BlockSpec((tm, Dout), lambda i: (i, 0)))
        out_shape = (row_shape, jax.ShapeDtypeStruct((M, Dout), jnp.float32))
    else:
        out_specs = row_spec
        out_shape = row_shape
    return pl.pallas_call(
        functools.partial(_mlp_kernel, activations=acts,
                          also_l2_norm=also_l2_norm),
        grid=(M // tm,),
        in_specs=in_specs, out_specs=out_specs, out_shape=out_shape,
        compiler_params=_cparams(("parallel",)),
    )(*args)


# -----------------------------------------------------------------------------
# Kernel 2: fused EnDecoder (2-layer enc + L2 norm + 2-layer dec + sigmoid)
# -----------------------------------------------------------------------------
def _endec_kernel(x_ref, we0, be0, we1, be1, wd0, bd0, wd1, bd1,
                  xpred_ref, znorm_ref):
    h = jnp.tanh(_dot(x_ref[...], we0[...]) + be0[...])
    z = _dot(h, we1[...]) + be1[...]
    zn = _l2_rows(z)                                  # F.normalize(z, dim=1)
    znorm_ref[...] = zn
    h2 = jnp.tanh(_dot(zn, wd0[...]) + bd0[...])
    xpred_ref[...] = jax.nn.sigmoid(_dot(h2, wd1[...]) + bd1[...])


def pallas_endecoder(p, x):
    (we0, be0), (we1, be1) = p["enc"]      # pre-transposed (in, out) weights
    (wd0, bd0), (wd1, bd1) = p["dec"]
    M, Din = x.shape
    latent = we1.shape[1]
    feat_out = wd1.shape[1]
    tm = _pick_row_tile(M, cap=512)

    in_specs = ([pl.BlockSpec((tm, Din), lambda i: (i, 0))]
                + [_resident_spec(a.shape)
                   for a in (we0, be0, we1, be1, wd0, bd0, wd1, bd1)])
    out_specs = (pl.BlockSpec((tm, feat_out), lambda i: (i, 0)),
                 pl.BlockSpec((tm, latent), lambda i: (i, 0)))
    out_shape = (jax.ShapeDtypeStruct((M, feat_out), jnp.float32),
                 jax.ShapeDtypeStruct((M, latent), jnp.float32))
    x_pred, z_norm = pl.pallas_call(
        _endec_kernel, grid=(M // tm,),
        in_specs=in_specs, out_specs=out_specs, out_shape=out_shape,
        compiler_params=_cparams(("parallel",)),
    )(x.astype(jnp.float32), we0, be0, we1, be1, wd0, bd0, wd1, bd1)
    return x_pred, z_norm


# -----------------------------------------------------------------------------
# Kernel 3: fused homophily pipeline -> homo_x, homo_a, S (bf16), deg^-1
#   row-tiled over N; gram products run as bf16 MXU feeds against the resident
#   pre-transposed z; deg^-1 is emitted so graph_enc never re-normalizes S.
# -----------------------------------------------------------------------------
def _homo_kernel(zxr_ref, zxT_ref, zar_ref, zaT_ref,
                 hx_ref, ha_ref, s_ref, dinv_ref, *, w0, w1, k):
    tm = zxr_ref.shape[0]
    hx = _dot_bf16(zxr_ref[...], zxT_ref[...])        # (tm, N) gram rows
    ha = _dot_bf16(zar_ref[...], zaT_ref[...])
    hx_ref[...] = hx
    ha_ref[...] = ha

    Sc = (w0 * _l2_rows(hx) + w1 * _l2_rows(ha)) * (1.0 / (w0 + w1))

    # per-row k-th largest via k max/knockout passes (matches torch.topk
    # selection unless there are exact ties).
    # TODO(synk): for large k switch to a value-bisection threshold (O(log)
    # passes, fewer live (tm, N) temporaries).
    tmp = Sc
    kth = jnp.max(tmp, axis=-1, keepdims=True)
    for _ in range(k - 1):
        tmp = jnp.where(tmp >= kth, -jnp.inf, tmp)
        kth = jnp.max(tmp, axis=-1, keepdims=True)
    s_dis = (Sc >= kth).astype(jnp.float32)           # replaces dense scatter

    rows = pl.program_id(0) * tm + jax.lax.broadcasted_iota(
        jnp.int32, Sc.shape, 0)
    cols = jax.lax.broadcasted_iota(jnp.int32, Sc.shape, 1)
    s = s_dis + jnp.where(rows == cols, 1.0, 0.0)     # + eye(N)
    s_ref[...] = s.astype(s_ref.dtype)                # bf16: 0/1/2 are exact

    deg = jnp.sum(s, axis=-1, keepdims=True)          # row degree (once)
    dinv_ref[...] = jnp.where(deg > 0.0,
                              pl.reciprocal(deg, approx=True), 0.0)


def pallas_homophily(zx, za, w0, w1, k):
    N, Dx = zx.shape
    Da = za.shape[1]
    zx32 = zx.astype(jnp.float32)
    za32 = za.astype(jnp.float32)
    zxT = zx32.T                    # one-time host/XLA transpose (N x D small)
    zaT = za32.T
    tm = _pick_row_tile(N, cap=_homo_row_cap(N, Dx, Da), multiple=16)
    in_specs = [pl.BlockSpec((tm, Dx), lambda i: (i, 0)),
                _resident_spec((Dx, N)),
                pl.BlockSpec((tm, Da), lambda i: (i, 0)),
                _resident_spec((Da, N))]
    out_specs = (pl.BlockSpec((tm, N), lambda i: (i, 0)),
                 pl.BlockSpec((tm, N), lambda i: (i, 0)),
                 pl.BlockSpec((tm, N), lambda i: (i, 0)),
                 pl.BlockSpec((tm, 1), lambda i: (i, 0)))
    out_shape = (jax.ShapeDtypeStruct((N, N), jnp.float32),
                 jax.ShapeDtypeStruct((N, N), jnp.float32),
                 jax.ShapeDtypeStruct((N, N), jnp.bfloat16),   # S: 0/1/2 exact
                 jax.ShapeDtypeStruct((N, 1), jnp.float32))
    return pl.pallas_call(
        functools.partial(_homo_kernel, w0=float(w0), w1=float(w1), k=int(k)),
        grid=(N // tm,),
        in_specs=in_specs, out_specs=out_specs, out_shape=out_shape,
        compiler_params=_cparams(("parallel",)),
    )(zx32, zxT, za32, zaT)


# -----------------------------------------------------------------------------
# Kernel 4: GraphEnc — one row-parallel pallas_call per order step.
#   h_new = deg^-1 * (S @ h) + x ; final step also L2-normalizes (the wrapping
#   F.normalize in SMHGC.forward).  No cross-iteration scratch carry, so the
#   row axis is truly "parallel" (both v7x TensorCores participate).
# -----------------------------------------------------------------------------
def _mp_step_kernel(s_ref, dinv_ref, h_ref, x_ref, o_ref, *, final):
    acc = _dot_bf16(s_ref[...], h_ref[...])           # (tm, D), f32 accum
    h_new = acc * dinv_ref[...] + x_ref[...]          # row-normalized adj
    if final:
        h_new = _l2_rows(h_new)                       # F.normalize(h, dim=-1)
    o_ref[...] = h_new


def pallas_graph_enc(S_bf16, dinv, z, order=2):
    N, D = z.shape
    z32 = z.astype(jnp.float32)
    if order <= 0:
        return z32 / jnp.maximum(
            jnp.linalg.norm(z32, axis=-1, keepdims=True), 1e-12)
    tm = _pick_row_tile(N, cap=_mp_row_cap(N, D), multiple=16)
    h = z32
    for t in range(order):
        final = (t == order - 1)
        h = pl.pallas_call(
            functools.partial(_mp_step_kernel, final=final),
            grid=(N // tm,),
            in_specs=[pl.BlockSpec((tm, N), lambda i: (i, 0)),
                      pl.BlockSpec((tm, 1), lambda i: (i, 0)),
                      _resident_spec((N, D)),
                      pl.BlockSpec((tm, D), lambda i: (i, 0))],
            out_specs=pl.BlockSpec((tm, D), lambda i: (i, 0)),
            out_shape=jax.ShapeDtypeStruct((N, D), jnp.float32),
            compiler_params=_cparams(("parallel",)),
        )(S_bf16, dinv, h, z32)
    return h


# -----------------------------------------------------------------------------
# Kernel 5: Student-t soft assignment (alpha=1); lane-dense padded output
# -----------------------------------------------------------------------------
def _predict_q_kernel(z_ref, cT_ref, cc_ref, q_ref, *, num_classes):
    z = z_ref[...]
    zz = jnp.sum(z * z, axis=-1, keepdims=True)           # (tm, 1)
    cross = _dot(z, cT_ref[...])                          # (tm, Kp)
    dist = jnp.maximum(zz - 2.0 * cross + cc_ref[...], 0.0)   # ||z-c||^2 >= 0
    q = 1.0 / (1.0 + dist)                # alpha=1 -> exponent (alpha+1)/2 = 1
    cols = jax.lax.broadcasted_iota(jnp.int32, q.shape, 1)
    q = jnp.where(cols < num_classes, q, 0.0)             # mask lane padding
    denom = jnp.sum(q, axis=-1, keepdims=True)
    q_ref[...] = q / denom                # exact division (sum-to-1 parity)


def pallas_predict_distribution(z, centroids):
    N, D = z.shape
    K = centroids.shape[0]
    Kp = max(128, ((K + 127) // 128) * 128)                # lane-dense width
    c = centroids.astype(jnp.float32)
    cT = jnp.zeros((D, Kp), jnp.float32).at[:, :K].set(c.T)
    cc = jnp.zeros((1, Kp), jnp.float32).at[:, :K].set(
        jnp.sum(c * c, axis=-1)[None, :])
    tm = _pick_row_tile(N, cap=512)
    q_pad = pl.pallas_call(
        functools.partial(_predict_q_kernel, num_classes=int(K)),
        grid=(N // tm,),
        in_specs=[pl.BlockSpec((tm, D), lambda i: (i, 0)),
                  _resident_spec((D, Kp)),
                  _resident_spec((1, Kp))],
        out_specs=pl.BlockSpec((tm, Kp), lambda i: (i, 0)),
        out_shape=jax.ShapeDtypeStruct((N, Kp), jnp.float32),
        compiler_params=_cparams(("parallel",)),
    )(z.astype(jnp.float32), cT, cc)
    return q_pad[:, :K]


# -----------------------------------------------------------------------------
# Model glue (weights_a / weights_h are Python-float hyperparameters)
# -----------------------------------------------------------------------------
def sim_info_extror_forward(p, x, adj, weights_a, k):
    zx, zx_norm = fused_mlp(p["x_extr"], x, also_l2_norm=True)
    za, za_norm = fused_mlp(p["a_extr"], adj, also_l2_norm=True)
    homo_x, homo_a, S_bf16, dinv = pallas_homophily(
        zx, za, weights_a[0], weights_a[1], k)
    return zx_norm, homo_x, za_norm, homo_a, S_bf16, dinv


def smhgc_forward(params, xs, adjs, weights_a, weights_h, order, k):
    view_num = len(xs)
    zx_norms, homo_xs, za_norms, homo_as = [], [], [], []
    hs, qgs, x_preds, Ss = [], [], [], []
    for v in range(view_num):
        pv = params["views"][v]
        zx_norm, homo_x, za_norm, homo_a, S_bf16, dinv = (
            sim_info_extror_forward(pv["homo_extr"], xs[v], adjs[v],
                                    weights_a[v], k))
        zx_norms.append(zx_norm)
        homo_xs.append(homo_x)
        za_norms.append(za_norm)
        homo_as.append(homo_a)

        x_pred, z_norm = pallas_endecoder(pv["endec"], xs[v])
        x_preds.append(x_pred)

        h = pallas_graph_enc(S_bf16, dinv, z_norm, order=order)
        hs.append(h)

        qgs.append(pallas_predict_distribution(h, params["cluster"][v]))
        Ss.append(S_bf16.astype(jnp.float32))      # return S as f32 (exact)

    h_all = sum(weights_h[v] * hs[v] for v in range(view_num)) / sum(weights_h)
    qgs.append(pallas_predict_distribution(h_all, params["cluster"][view_num]))
    return zx_norms, homo_xs, za_norms, homo_as, hs, h_all, qgs, x_preds, Ss


# -----------------------------------------------------------------------------
# Deterministic parameter construction (mirrors the PyTorch module shapes)
# -----------------------------------------------------------------------------
def init_linear(key, in_dim, out_dim):
    kw, kb = jax.random.split(key)
    bound = 1.0 / math.sqrt(in_dim)
    W = jax.random.uniform(kw, (out_dim, in_dim), jnp.float32, -bound, bound)
    b = jax.random.uniform(kb, (out_dim,), jnp.float32, -bound, bound)
    return W, b


def mlp_layer_dims(input_dim, hidden_dim, output_dim, num_layers, step):
    dims = [(input_dim, hidden_dim)]
    tmp = hidden_dim
    for i in range(1, num_layers):
        if i == num_layers - 1:
            dims.append((tmp, output_dim))
        else:
            tmp_h = tmp
            tmp = int(tmp / step)
            if tmp < output_dim:
                tmp = tmp_h
            dims.append((tmp_h, tmp))
    return dims


def init_mlp(key, dims):
    keys = jax.random.split(key, len(dims))
    return [init_linear(k, i, o) for k, (i, o) in zip(keys, dims)]


def build_params(key, cfg):
    view_num = cfg["view_num"]
    views = []
    for _ in range(view_num):
        key, kx, ka, ke, kd = jax.random.split(key, 5)
        x_extr = init_mlp(kx, mlp_layer_dims(cfg["in_x"], cfg["hid_x"],
                                             cfg["out_x"], cfg["num_layers_x"],
                                             cfg["step_x"]))
        a_extr = init_mlp(ka, mlp_layer_dims(cfg["in_a"], cfg["hid_a"],
                                             cfg["out_a"], cfg["num_layers_a"],
                                             cfg["step_a"]))
        enc = init_mlp(ke, [(cfg["in_g"], cfg["hid_g"]),
                            (cfg["hid_g"], cfg["out_g"])])
        dec = init_mlp(kd, [(cfg["out_g"], cfg["hid_g"]),
                            (cfg["hid_g"], cfg["in_g"])])
        views.append({"homo_extr": {"x_extr": x_extr, "a_extr": a_extr},
                      "endec": {"enc": enc, "dec": dec}})
    cluster = []
    for _ in range(view_num + 1):
        key, kc = jax.random.split(key)
        cluster.append(jax.random.normal(kc, (cfg["class_num"], cfg["out_g"]),
                                         jnp.float32))
    return {"views": views, "cluster": cluster}


def preprocess_params(params):
    """One-time host prep: transpose weights to (in, out), biases to (1, out)."""
    def prep_lin(W, b):
        return (jnp.asarray(W, jnp.float32).T,
                jnp.asarray(b, jnp.float32).reshape(1, -1))

    def prep_mlp(layers):
        return [prep_lin(W, b) for (W, b) in layers]

    views = []
    for v in params["views"]:
        views.append({
            "homo_extr": {"x_extr": prep_mlp(v["homo_extr"]["x_extr"]),
                          "a_extr": prep_mlp(v["homo_extr"]["a_extr"])},
            "endec": {"enc": prep_mlp(v["endec"]["enc"]),
                      "dec": prep_mlp(v["endec"]["dec"])},
        })
    cluster = [jnp.asarray(c, jnp.float32) for c in params["cluster"]]
    return {"views": views, "cluster": cluster}


# -----------------------------------------------------------------------------
if __name__ == "__main__":
    key = jax.random.PRNGKey(0)

    cfg = dict(view_num=2, node_num=16,
               in_x=32, hid_x=16, out_x=8,
               in_a=16, hid_a=16, out_a=8,   # in_a == node_num (adj rows)
               in_g=32, hid_g=16, out_g=8,   # in_g == in_x (endec eats xs[v])
               class_num=3, order=2, k=4,
               num_layers_x=2, step_x=2, num_layers_a=4, step_a=2)

    key, kp = jax.random.split(key)
    params = preprocess_params(build_params(kp, cfg))

    xs, adjs = [], []
    for _ in range(cfg["view_num"]):
        key, kx, ka = jax.random.split(key, 3)
        xs.append(jax.random.normal(kx, (cfg["node_num"], cfg["in_x"]),
                                    jnp.float32))
        a = jax.random.uniform(ka, (cfg["node_num"], cfg["node_num"]),
                               jnp.float32)
        a = 0.5 * (a + a.T) + jnp.eye(cfg["node_num"], dtype=jnp.float32)
        adjs.append(a)

    weights_a = [[1.0, 1.0] for _ in range(cfg["view_num"])]
    weights_h = [1.0 for _ in range(cfg["view_num"])]

    out = smhgc_forward(params, xs, adjs, weights_a, weights_h,
                        order=cfg["order"], k=cfg["k"])
    out = jax.block_until_ready(out)

    (zx_norms, homo_xs, za_norms, homo_as, hs, h_all, qgs, x_preds, Ss) = out
    assert h_all.shape == (cfg["node_num"], cfg["out_g"])
    assert qgs[-1].shape == (cfg["node_num"], cfg["class_num"])
    assert x_preds[0].shape == (cfg["node_num"], cfg["in_x"])
    assert Ss[0].shape == (cfg["node_num"], cfg["node_num"])
    assert homo_xs[0].shape == (cfg["node_num"], cfg["node_num"])
    # internal-consistency checks (guaranteed by construction)
    assert bool(jnp.allclose(jnp.sum(qgs[-1], axis=-1), 1.0, atol=1e-3))
    assert bool(jnp.allclose(jnp.sum(hs[0] * hs[0], axis=-1), 1.0, atol=1e-2))
    print("KERNEL_OK")
</pallas_src>

<mosaic_0001>
module attributes {stable_mosaic.version = 11 : i64} {
  func.func @_k(%arg0: i32, %arg1: memref<8x128xf32, #tpu.memory_space<vmem>>, %arg2: memref<8x128xf32, #tpu.memory_space<vmem>>) attributes {dimension_semantics = [#tpu.dimension_semantics<arbitrary>], iteration_bounds = array<i64: 2>, scalar_prefetch = 0 : i64, scratch_operands = 0 : i64, tpu.core_type = #tpu.core_type<tc>, window_params = [{pipeline_mode = #tpu.pipeline_mode<synchronous>, transform_indices = @transform_0, window_bounds = array<i64: 8, 128>}, {transform_indices = @transform_1, window_bounds = array<i64: 8, 128>}]} {
    %c0 = arith.constant 0 : index
    %c0_0 = arith.constant 0 : index
    %0 = vector.load %arg1[%c0, %c0_0] : memref<8x128xf32, #tpu.memory_space<vmem>>, vector<8x128xf32>
    %cst = arith.constant 1.000000e+00 : f32
    %1 = vector.broadcast %cst : f32 to vector<8x128xf32>
    %2 = arith.addf %0, %1 : vector<8x128xf32>
    %c0_1 = arith.constant 0 : index
    %c0_2 = arith.constant 0 : index
    %3 = vector.load %arg2[%c0_1, %c0_2] : memref<8x128xf32, #tpu.memory_space<vmem>>, vector<8x128xf32>
    tpu.vector_store %arg2[%c0_1, %c0_2], %2 {strides = array<i32>} : memref<8x128xf32, #tpu.memory_space<vmem>>, vector<8x128xf32>,
    return
  }
  func.func @transform_0(%arg0: i32) -> (i32, i32) {
    %c0_i32 = arith.constant 0 : i32
    %c0_i32_0 = arith.constant 0 : i32
    %c0_i32_1 = arith.constant 0 : i32
    return %c0_i32, %c0_i32_0 : i32, i32
  }
  func.func @transform_1(%arg0: i32) -> (i32, i32) {
    %c0_i32 = arith.constant 0 : i32
    %c0_i32_0 = arith.constant 0 : i32
    return %arg0, %c0_i32 : i32, i32
  }
}

module attributes {stable_mosaic.version = 11 : i64} {
  func.func @_mlp_kernel(%arg0: i32, %arg1: memref<16x32xf32, #tpu.memory_space<vmem>>, %arg2: memref<32x16xf32, #tpu.memory_space<vmem>>, %arg3: memref<1x16xf32, #tpu.memory_space<vmem>>, %arg4: memref<16x8xf32, #tpu.memory_space<vmem>>, %arg5: memref<1x8xf32, #tpu.memory_space<vmem>>, %arg6: memref<16x8xf32, #tpu.memory_space<vmem>>, %arg7: memref<16x8xf32, #tpu.memory_space<vmem>>) attributes {dimension_semantics = [#tpu.dimension_semantics<parallel>], iteration_bounds = array<i64: 1>, scalar_prefetch = 0 : i64, scratch_operands = 0 : i64, tpu.core_type = #tpu.core_type<tc>, window_params = [{transform_indices = @transform_0, window_bounds = array<i64: 16, 32>}, {pipeline_mode = #tpu.pipeline_mode<synchronous>, transform_indices = @transform_1, window_bounds = array<i64: 32, 16>}, {pipeline_mode = #tpu.pipeline_mode<synchronous>, transform_indices = @transform_2, window_bounds = array<i64: 1, 16>}, {pipeline_mode = #tpu.pipeline_mode<synchronous>, transform_indices = @transform_3, window_bounds = array<i64: 16, 8>}, {pipeline_mode = #tpu.pipeline_mode<synchronous>, transform_indices = @transform_4, window_bounds = array<i64: 1, 8>}, {transform_indices = @transform_5, window_bounds = array<i64: 16, 8>}, {transform_indices = @transform_6, window_bounds = array<i64: 16, 8>}]} {
    %c0 = arith.constant 0 : index
    %c0_0 = arith.constant 0 : index
    %0 = vector.load %arg1[%c0, %c0_0] : memref<16x32xf32, #tpu.memory_space<vmem>>, vector<16x32xf32>
    %c0_1 = arith.constant 0 : index
    %c0_2 = arith.constant 0 : index
    %1 = vector.load %arg2[%c0_1, %c0_2] : memref<32x16xf32, #tpu.memory_space<vmem>>, vector<32x16xf32>
    %c0_3 = arith.constant 0 : index
    %c0_4 = arith.constant 0 : index
    %2 = vector.load %arg3[%c0_3, %c0_4] : memref<1x16xf32, #tpu.memory_space<vmem>>, vector<1x16xf32>
    %cst = arith.constant dense<0.000000e+00> : vector<16x16xf32>
    %3 = tpu.matmul %0, %1, %cst {dimension_numbers = #tpu.dot_dimension_numbers<[1], [0], [0], [1], [0, 0, 1, 1], [], []>} : vector<16x32xf32>, vector<32x16xf32>, vector<16x16xf32> -> vector<16x16xf32>
    %4 = vector.broadcast %2 : vector<1x16xf32> to vector<16x16xf32>
    %5 = arith.addf %3, %4 : vector<16x16xf32>
    %6 = math.tanh %5 : vector<16x16xf32>
    %c0_5 = arith.constant 0 : index
    %c0_6 = arith.constant 0 : index
    %7 = vector.load %arg4[%c0_5, %c0_6] : memref<16x8xf32, #tpu.memory_space<vmem>>, vector<16x8xf32>
    %c0_7 = arith.constant 0 : index
    %c0_8 = arith.constant 0 : index
    %8 = vector.load %arg5[%c0_7, %c0_8] : memref<1x8xf32, #tpu.memory_space<vmem>>, vector<1x8xf32>
    %cst_9 = arith.constant dense<0.000000e+00> : vector<16x8xf32>
    %9 = tpu.matmul %6, %7, %cst_9 {dimension_numbers = #tpu.dot_dimension_numbers<[1], [0], [0], [1], [0, 0, 1, 1], [], []>} : vector<16x16xf32>, vector<16x8xf32>, vector<16x8xf32> -> vector<16x8xf32>
    %10 = vector.broadcast %8 : vector<1x8xf32> to vector<16x8xf32>
    %11 = arith.addf %9, %10 : vector<16x8xf32>
    %c0_10 = arith.constant 0 : index
    %c0_11 = arith.constant 0 : index
    %12 = vector.load %arg6[%c0_10, %c0_11] : memref<16x8xf32, #tpu.memory_space<vmem>>, vector<16x8xf32>
    tpu.vector_store %arg6[%c0_10, %c0_11], %11 {strides = array<i32>} : memref<16x8xf32, #tpu.memory_space<vmem>>, vector<16x8xf32>,
    %13 = arith.mulf %11, %11 : vector<16x8xf32>
    %cst_12 = arith.constant dense<0.000000e+00> : vector<16xf32>
    %14 = vector.multi_reduction <add>, %13, %cst_12 [1] : vector<16x8xf32> to vector<16xf32>
    %15 = vector.shape_cast %14 : vector<16xf32> to vector<16x1xf32>
    %cst_13 = arith.constant 1.000000e-24 : f32
    %16 = vector.broadcast %cst_13 : f32 to vector<16x1xf32>
    %17 = arith.maximumf %15, %16 : vector<16x1xf32>
    %18 = math.rsqrt %17 : vector<16x1xf32>
    %19 = vector.broadcast %18 : vector<16x1xf32> to vector<16x8xf32>
    %20 = arith.mulf %11, %19 : vector<16x8xf32>
    %c0_14 = arith.constant 0 : index
    %c0_15 = arith.constant 0 : index
    %21 = vector.load %arg7[%c0_14, %c0_15] : memref<16x8xf32, #tpu.memory_space<vmem>>, vector<16x8xf32>
    tpu.vector_store %arg7[%c0_14, %c0_15], %20 {strides = array<i32>} : memref<16x8xf32, #tpu.memory_space<vmem>>, vector<16x8xf32>,
    return
  }
  func.func @transform_0(%arg0: i32) -> (i32, i32) {
    %c0_i32 = arith.constant 0 : i32
    %c0_i32_0 = arith.constant 0 : i32
    return %arg0, %c0_i32 : i32, i32
  }
  func.func @transform_1(%arg0: i32) -> (i32, i32) {
    %c0_i32 = arith.constant 0 : i32
    %c0_i32_0 = arith.constant 0 : i32
    %c0_i32_1 = arith.constant 0 : i32
    return %c0_i32, %c0_i32_0 : i32, i32
  }
  func.func @transform_2(%arg0: i32) -> (i32, i32) {
    %c0_i32 = arith.constant 0 : i32
    %c0_i32_0 = arith.constant 0 : i32
    %c0_i32_1 = arith.constant 0 : i32
    return %c0_i32, %c0_i32_0 : i32, i32
  }
  func.func @transform_3(%arg0: i32) -> (i32, i32) {
    %c0_i32 = arith.constant 0 : i32
    %c0_i32_0 = arith.constant 0 : i32
    %c0_i32_1 = arith.constant 0 : i32
    return %c0_i32, %c0_i32_0 : i32, i32
  }
  func.func @transform_4(%arg0: i32) -> (i32, i32) {
    %c0_i32 = arith.constant 0 : i32
    %c0_i32_0 = arith.constant 0 : i32
    %c0_i32_1 = arith.constant 0 : i32
    return %c0_i32, %c0_i32_0 : i32, i32
  }
  func.func @transform_5(%arg0: i32) -> (i32, i32) {
    %c0_i32 = arith.constant 0 : i32
    %c0_i32_0 = arith.constant 0 : i32
    return %arg0, %c0_i32 : i32, i32
  }
  func.func @transform_6(%arg0: i32) -> (i32, i32) {
    %c0_i32 = arith.constant 0 : i32
    %c0_i32_0 = arith.constant 0 : i32
    return %arg0, %c0_i32 : i32, i32
  }
}

</mosaic_0001>

<bundles_post_ra>
// kernel: tpu_custom_call.1
= control target key start
LH: loop header
LB: loop body
LE: loop exit
PB: predicated region body
PF: predicated region fallthrough
CT: control target
= control target key end

     0   :  { %6 = vsyncpa [#allocation3], 0  ;;  %s482_s0 = inlined_call_operand.hbm [shape: f32[8,128], index: 0, kind: input, shape index: {}]   ;;  %s483_s1 = inlined_call_operand.hbm [shape: f32[16,128], index: 1, kind: output, shape index: {}]  }
   0x1   :  { %7 = vsyncpa [#allocation4], 0 }
   0x2   :  { %9 = vsyncpa [#allocation4 + $0x1], 0  ;;  %s352_s6 = smov 0   ;;  %s354_s7 = smov 0  }
   0x3   :  { %s356_s8 = smov 0   ;;  %s358_s9 = smov 0  }
   0x4 LB: > { %s373_s10 = sadd.s32 4294967295, %s338_s9   ;;  %s184_s11 = sadd.s32 4294967294, %s338_s9   ;;  %s338_s9 = sphi %s358_s9, %s499_s9   ;;  %s334_s8 = sphi %s356_s8, %s498_s8   ;;  %s330_s7 = sphi %s354_s7, %s497_s7   ;;  %s326_s6 = sphi %s352_s6, %s496_s6  }
   0x5   : > { %s377_s12 = sadd.s32 1, %s338_s9   ;;  %s43_s13 = sadd.s32 1, %s334_s8 }
   0x6   : > { %s40_s14 = ssub.s32 %s338_s9, %s377_s12  ;;  %p53_p0 = scmp.ne.s32.totalorder %s334_s8, %s330_s7 }
   0x7   : > { %p41_p1 = scmp.eq.s32.totalorder %s40_s14, 0  ;;  %p54_p2 = scmp.eq.s32.totalorder %s373_s10, 1 }
   0x8   : > { %p59_p3 = scmp.ne.s32.totalorder %s330_s7, %s326_s6  ;;  %p60_p4 = scmp.eq.s32.totalorder %s184_s11, 1 }
   0x9   : > { %s388_s15 = scalar_select %p41_p1, %s334_s8, %s43_s13  }
   0xa   : > { %p390_p5 = por %p54_p2, %p53_p0  ;;  %p394_p6 = por %p60_p4, %p59_p3 }
   0xb   : > { %p185_p7 = scmp.ge.s32.totalorder %s338_s9, 1  ;;  %p67_p8 = scmp.lt.s32.totalorder %s338_s9, 3 }
   0xc   : > { %s487_s16 = scalar_select %p390_p5, 1, 0 }
   0xd   : > { %s488_s17 = scalar_select %p394_p6, 1, 0 }
   0xe   : > { %p484_p9 = scmp.eq.s32.totalorder %s373_s10, 0  ;;  %p401_p10 = pnand %p185_p7, %p67_p8 }
   0xf   : > { %s340_s19 = smov [#allocation2]   ;;  %s244_s24 = scalar_lea.hbm %s482_s0, 128 }
  0x10   : > { %s489_s18 = scalar_select %p401_p10, 1, 0 }
  0x11   : > { %s80_s20 = sshll.u32 %s340_s19, 4  ;;  %p200_p11 = pneg %p401_p10  ;;  %s81_s20 = int_to_ptr.vmem [resolvable:$true] %s80_s20 }
  0x12   : > { %p245_p13 = scmp.ne.s32.totalorder %s482_s0, %s244_s24  ;;  %p251_p3 = scmp.lt.u32.totalorder %s244_s24, %s482_s0 }
  0x13   : > { %p409_p12 = pnand %p484_p9, %p200_p11 }
  0x15   : > { %p246_p0 = pneg %p409_p12 }
  0x17   : > { %p247_p1 = pnand %p246_p0, %p245_p13 }
  0x19   : > { %p248_p2 = pneg %p247_p1 }
  0x1b   : > { %p253_p4 = pnand %p251_p3, %p248_p2 }
  0x1d   : > { %256 = shalt.err (!%p253_p4)
}
  0x1e   : > { %s257_s29 = scalar_lea.vmem %s81_s20, 128  ;;  %p265_p9 = scmp.lt.s32.totalorder %s81_s20, %s81_s20 }
  0x1f   : > { %p258_p7 = scmp.ne.s32.totalorder %s81_s20, %s257_s29  ;;  %p266_p6 = scmp.lt.s32.totalorder %s257_s29, %s257_s29 }
  0x21   : > { %p260_p8 = pnand %p258_p7, %p246_p0  ;;  %p267_p5 = por %p266_p6, %p265_p9 }
  0x23   : > { %p261_p11 = pneg %p260_p8 }
  0x25   : > { %p268_p10 = pnand %p267_p5, %p261_p11 }
  0x27   : > { %271 = shalt.err (!%p268_p10)
}
  0x28   : > { %203 = dma.hbm_to_vmem [thread:$0]  (!%p409_p12), %s482_s0, 128, %s81_s20, [#allocation3]  }
  0x29   : > { %p491_p13 = scmp.ne.s32.totalorder %s489_s18, 0 }
  0x2a   : > { %p492_p1 = scmp.eq.s32.totalorder (!%p491_p13), %s373_s10, 0 }
  0x2b   : > { %93 = sbr.rel (%p491_p13) target bundleno = 77 (0x4d), region = 24 }
  0x32   : > { %317 = dma.done.wait (%p492_p1), [#allocation3], 128   ;;  %p493_p0 = pmov %p492_p1 }
  0x33   : > { %s105_s3 = sand.u32 1, %s330_s7   ;;  %s191_s13 = sshll.u32 %s373_s10, 7  ;;  %v108_v0 = vld [vmem:[#allocation2] sm:$0xff] }
  0x34   : > { %319 = vsyncadd (%p493_p0), [#allocation3], 4294967168  ;;  %s189_s4 = sshll.u32 %s105_s3, 3  ;;  %v109_v1 = vadd.f32 1.0, %v108_v0  ;;  %s442_s19 = scalar_lea.hbm %s483_s1, %s191_s13 }
  0x35   : > { %s107_s5 = scalar_lea.vmem [#allocation5], %s189_s4  ;;  %s112_s20 = scalar_lea.sflag [#allocation4], %s105_s3 }
  0x36   : > { %s125_s11 = sshll.u32 %s107_s5, 4  ;;  %110 = vst [vmem:[%s107_s5] sm:$0xff] %v109_v1  ;;  %p494_p6 = scmp.ne.s32.totalorder %s487_s16, 0  ;;  %s437_s11 = int_to_ptr.vmem [resolvable:$true] %s125_s11 }
  0x37   : > { %s272_s21 = scalar_lea.vmem %s437_s11, 128  ;;  %s341_s10 = smov [#allocation5]  }
  0x38   : > { %p273_p5 = scmp.ne.s32.totalorder %s437_s11, %s272_s21  ;;  %s276_s22 = sshll.u32 %s341_s10, 4  ;;  %s277_s22 = int_to_ptr.vmem [resolvable:$false] %s276_s22 }
  0x39   : > { %s278_s23 = scalar_lea.vmem %s277_s22, 256  ;;  %p279_p12 = scmp.lt.s32.totalorder %s437_s11, %s277_s22 }
  0x3a   : > { %p274_p9 = pnand %p273_p5, %p494_p6  ;;  %p280_p2 = scmp.lt.s32.totalorder %s278_s23, %s272_s21 }
  0x3c   : > { %p275_p10 = pneg %p274_p9  ;;  %p281_p3 = por %p280_p2, %p279_p12 }
  0x3e   : > { %p282_p4 = pnand %p281_p3, %p275_p10 }
  0x40   : > { %285 = shalt.err (!%p282_p4)
}
  0x41   : > { %s286_s24 = scalar_lea.hbm %s442_s19, 128  ;;  %s290_s27 = scalar_lea.hbm %s483_s1, 256 }
  0x42   : > { %p287_p7 = scmp.ne.s32.totalorder %s442_s19, %s286_s24  ;;  %p291_p13 = scmp.lt.u32.totalorder %s442_s19, %s483_s1 }
  0x43   : > { %p292_p1 = scmp.lt.u32.totalorder %s290_s27, %s286_s24  ;;  %p294_p5 = scmp.lt.u32.totalorder %s286_s24, %s442_s19 }
  0x44   : > { %p288_p8 = pnand %p287_p7, %p494_p6 }
  0x45   : > { %p293_p0 = por %p292_p1, %p291_p13 }
  0x46   : > { %p289_p11 = pneg %p288_p8 }
  0x47   : > { %p295_p9 = por %p294_p5, %p293_p0 }
  0x49   : > { %p296_p10 = pnand %p295_p9, %p289_p11 }
  0x4b   : > { %299 = shalt.err (!%p296_p10)
}
  0x4c   : > { %198 = dma.vmem_to_hbm [thread:$0]  (%p494_p6), %s437_s11, 128, %s442_s19, %s112_s20  }
  0x4d PF: > { %p210_p12 = scmp.ge.s32.totalorder %s338_s9, 2  ;;  %s137_s30 = sand.u32 1, %s326_s6  }
  0x4e   : > { %p495_p2 = scmp.ne.s32.totalorder %s488_s17, 0  ;;  %s138_s2 = scalar_lea.sflag [#allocation4], %s137_s30 }
  0x50   : > { %p205_p3 = pnand %p210_p12, %p495_p2 }
  0x52   : > { %321 = dma.done.wait (!%p205_p3), %s138_s2, 128  }
  0x53   : > { %323 = vsyncadd (!%p205_p3), %s138_s2, 4294967168  ;;  %p12_p4 = scmp.ge.s32.totalorder %s377_s12, 4   ;;  %s496_s6 = smov %s330_s7 }
  0x54   : > { %s497_s7 = smov %s334_s8  ;;  %s498_s8 = smov %s388_s15 }
  0x55   : > { %s499_s9 = smov %s377_s12  ;;  %14 = sbr.rel (!%p12_p4) target bundleno = 4 (0x4), region = 61 }
  0x5c   :  { %143 = vsyncpa [#allocation3], 1 }
  0x5d   :  { %145 = vsyncpa [#allocation3 + $0x1], 1 }
  0x5e   :  { %146 = vsyncpa [#allocation4], 1 }
  0x5f   :  { %148 = vsyncpa [#allocation4 + $0x1], 1 }

// kernel: tpu_custom_call.1
= control target key start
LH: loop header
LB: loop body
LE: loop exit
PB: predicated region body
PF: predicated region fallthrough
CT: control target
= control target key end

     0   :  { %12 = vsyncpa [#allocation3], 0  ;;  %s713_s0 = inlined_call_operand.hbm [shape: f32[16,32], index: 0, kind: input, shape index: {}]   ;;  %s714_s1 = inlined_call_operand.hbm [shape: f32[32,16], index: 1, kind: input, shape index: {}]   ;;  %s715_s2 = inlined_call_operand.hbm [shape: f32[1,16], index: 2, kind: input, shape index: {}]   ;;  %s716_s3 = inlined_call_operand.hbm [shape: f32[16,8], index: 3, kind: input, shape index: {}]   ;;  %s717_s4 = inlined_call_operand.hbm [shape: f32[1,8], index: 4, kind: input, shape index: {}]   ;;  %s718_s5 = inlined_call_operand.hbm [shape: f32[16,8], index: 5, kind: output, shape index: {0}]   ;;  %s719_s6 = inlined_call_operand.hbm [shape: f32[16,8], index: 6, kind: output, shape index: {1}]  }
   0x1   :  { %13 = vsyncpa [#allocation6], 0 }
   0x2   :  { %14 = vsyncpa [#allocation9], 0 }
   0x3   :  { %15 = vsyncpa [#allocation4], 0 }
   0x4   :  { %16 = vsyncpa [#allocation13], 0  ;;  %s557_s21 = smov [#allocation5]   ;;  %s558_s23 = smov [#allocation8]  }
   0x5   :  { %s34_s22 = sshll.u32 %s557_s21, 4  ;;  %s56_s24 = sshll.u32 %s558_s23, 4  ;;  %s35_s22 = int_to_ptr.vmem [resolvable:$true] %s34_s22  ;;  %s601_s24 = int_to_ptr.vmem [resolvable:$true] %s56_s24 }
   0x6   :  { %s393_s27 = scalar_lea.hbm %s714_s1, 512 }
   0x7   :  { %p394_p0 = scmp.ne.s32.totalorder %s714_s1, %s393_s27  ;;  %p397_p1 = scmp.lt.u32.totalorder %s393_s27, %s714_s1 }
   0x9   :  { %p399_p2 = pnand %p397_p1, %p394_p0 }
   0xb   :  { %402 = shalt.err (!%p399_p2)
}
   0xc   :  { %s403_s8 = scalar_lea.vmem %s35_s22, 512  ;;  %p408_p4 = scmp.lt.s32.totalorder %s35_s22, %s35_s22 }
   0xd   :  { %p404_p3 = scmp.ne.s32.totalorder %s35_s22, %s403_s8  ;;  %p409_p5 = scmp.lt.s32.totalorder %s403_s8, %s403_s8 }
   0xf   :  { %p410_p6 = por %p409_p5, %p408_p4 }
  0x11   :  { %p411_p7 = pnand %p410_p6, %p404_p3 }
  0x13   :  { %414 = shalt.err (!%p411_p7)
}
  0x14   :  { %s559_s9 = smov 128   ;;  %s560_s10 = smov 8  }
  0x15   :  { %40 = dma.hbm_to_vmem [thread:$0]  %s714_s1, 512, %s35_s22, [#allocation6], %s559_s9, %s559_s9, %s560_s10  }
  0x16   :  { %s415_s15 = scalar_lea.hbm %s716_s3, 256 }
  0x17   :  { %p416_p8 = scmp.ne.s32.totalorder %s716_s3, %s415_s15  ;;  %p419_p9 = scmp.lt.u32.totalorder %s415_s15, %s716_s3 }
  0x19   :  { %p421_p10 = pnand %p419_p9, %p416_p8 }
  0x1b   :  { %424 = shalt.err (!%p421_p10)
}
  0x1c   :  { %s425_s20 = scalar_lea.vmem %s601_s24, 256  ;;  %p430_p12 = scmp.lt.s32.totalorder %s601_s24, %s601_s24 }
  0x1d   :  { %p426_p11 = scmp.ne.s32.totalorder %s601_s24, %s425_s20  ;;  %p431_p13 = scmp.lt.s32.totalorder %s425_s20, %s425_s20 }
  0x1f   :  { %p432_p0 = por %p431_p13, %p430_p12 }
  0x21   :  { %p433_p1 = pnand %p432_p0, %p426_p11 }
  0x23   :  { %436 = shalt.err (!%p433_p1)
}
  0x24   :  { %62 = dma.hbm_to_vmem [thread:$0]  %s716_s3, 256, %s601_s24, [#allocation9], %s559_s9, %s559_s9, %s560_s10  }
  0x25   :  { %s561_s22 = smov [#allocation2]   ;;  %s562_s25 = smov [#allocation7]  }
  0x26   :  { %s22_s23 = sshll.u32 %s561_s22, 4  ;;  %s47_s26 = sshll.u32 %s562_s25, 4  ;;  %s23_s23 = int_to_ptr.vmem [resolvable:$true] %s22_s23  ;;  %s48_s26 = int_to_ptr.vmem [resolvable:$true] %s47_s26 }
  0x27   :  { %s437_s29 = scalar_lea.hbm %s713_s0, 256 }
  0x28   :  { %p438_p2 = scmp.ne.s32.totalorder %s713_s0, %s437_s29  ;;  %p441_p3 = scmp.lt.u32.totalorder %s437_s29, %s713_s0 }
  0x2a   :  { %p443_p4 = pnand %p441_p3, %p438_p2 }
  0x2c   :  { %446 = shalt.err (!%p443_p4)
}
  0x2d   :  { %s447_s3 = scalar_lea.vmem %s23_s23, 256  ;;  %p452_p6 = scmp.lt.s32.totalorder %s23_s23, %s23_s23 }
  0x2e   :  { %p448_p5 = scmp.ne.s32.totalorder %s23_s23, %s447_s3  ;;  %p453_p7 = scmp.lt.s32.totalorder %s447_s3, %s447_s3 }
  0x30   :  { %p454_p8 = por %p453_p7, %p452_p6 }
  0x32   :  { %p455_p9 = pnand %p454_p8, %p448_p5 }
  0x34   :  { %458 = shalt.err (!%p455_p9)
}
  0x35   :  { %28 = dma.hbm_to_vmem [thread:$0]  %s713_s0, 256, %s23_s23, [#allocation3], %s559_s9, %s559_s9, %s560_s10  }
  0x36   :  { %s459_s15 = scalar_lea.hbm %s715_s2, 16 }
  0x37   :  { %p460_p10 = scmp.ne.s32.totalorder %s715_s2, %s459_s15  ;;  %p463_p11 = scmp.lt.u32.totalorder %s459_s15, %s715_s2 }
  0x39   :  { %p465_p12 = pnand %p463_p11, %p460_p10 }
  0x3b   :  { %468 = shalt.err (!%p465_p12)
}
  0x3c   :  { %s469_s20 = scalar_lea.vmem %s48_s26, 16  ;;  %s473_s1 = scalar_lea.vmem %s48_s26, 32 }
  0x3d   :  { %p470_p13 = scmp.ne.s32.totalorder %s48_s26, %s469_s20  ;;  %p474_p0 = scmp.lt.s32.totalorder %s48_s26, %s48_s26 }
  0x3e   :  { %p475_p1 = scmp.lt.s32.totalorder %s473_s1, %s469_s20 }
  0x40   :  { %p476_p2 = por %p475_p1, %p474_p0 }
  0x42   :  { %p477_p3 = pnand %p476_p2, %p470_p13 }
  0x44   :  { %480 = shalt.err (!%p477_p3)
}
  0x45   :  { %50 = dma.hbm_to_vmem [thread:$0]  %s715_s2, 16, %s48_s26, [#allocation6]  }
  0x46   :  { %s563_s22 = smov [#allocation10]   ;;  %s481_s28 = scalar_lea.hbm %s717_s4, 16 }
  0x47   :  { %s69_s23 = sshll.u32 %s563_s22, 4  ;;  %p482_p4 = scmp.ne.s32.totalorder %s717_s4, %s481_s28  ;;  %s70_s23 = int_to_ptr.vmem [resolvable:$true] %s69_s23 }
  0x48   :  { %p485_p5 = scmp.lt.u32.totalorder %s481_s28, %s717_s4 }
  0x4a   :  { %p487_p6 = pnand %p485_p5, %p482_p4 }
  0x4c   :  { %490 = shalt.err (!%p487_p6)
}
  0x4d   :  { %s491_s11 = scalar_lea.vmem %s70_s23, 16  ;;  %s495_s2 = scalar_lea.vmem %s70_s23, 32 }
  0x4e   :  { %p492_p7 = scmp.ne.s32.totalorder %s70_s23, %s491_s11  ;;  %p496_p8 = scmp.lt.s32.totalorder %s70_s23, %s70_s23 }
  0x4f   :  { %p497_p9 = scmp.lt.s32.totalorder %s495_s2, %s491_s11 }
  0x51   :  { %p498_p10 = por %p497_p9, %p496_p8 }
  0x53   :  { %p499_p11 = pnand %p498_p10, %p492_p7 }
  0x55   :  { %502 = shalt.err (!%p499_p11)
}
  0x56   :  { %72 = dma.hbm_to_vmem [thread:$0]  %s717_s4, 16, %s70_s23, [#allocation9]  }
  0x57   :  { %547 = dma.done.wait [#allocation3], 256  }
  0x58   :  { %548 = vsyncadd [#allocation3], 4294967040 }
  0x59   :  { %549 = dma.done.wait [#allocation6], 528  }
  0x5a   :  { %550 = vsyncadd [#allocation6], 4294966768 }
  0x5b   :  { %551 = dma.done.wait [#allocation9], 272  }
  0x5c   :  { %552 = vsyncadd [#allocation9], 4294967024  ;;  %vm101_vm0 = vcmask 261120   ;;  %v90_v0 = vld [vmem:[#allocation5] sm:$0xff]  ;;  %v91_v1 = vld [vmem:[#allocation5 + $0x8] sm:$0xff]  ;;  %vm194_vm1 = vcmask 130048  }
  0x5d   :  { %v92_v2 = vld [vmem:[#allocation5 + $0x10] sm:$0xff]  ;;  %v364_v3 = vpack.c.bf16 %v91_v1, %v90_v0  ;;  %v93_v4 = vld [vmem:[#allocation5 + $0x18] sm:$0xff]  ;;  %v185_v8 = vld [vmem:[#allocation8] sm:$0xff]  ;;  %vm276_vm2 = vcmask 64512   ;;  %s564_s4 = smov [#allocation11]  }
  0x5e   :  { %v88_v5 = vld [vmem:[#allocation2] sm:$0xff]  ;;  %v368_v6 = vpack.c.bf16 %v93_v4, %v92_v2  ;;  %v89_v7 = vld [vmem:[#allocation2 + $0x8] sm:$0xff]  ;;  %v330_v11 = vld [vmem:[#allocation7] ss:$0 sm:$0xff]  ;;  %s300_s24 = sshll.u32 %s564_s4, 4  ;;  %s301_s24 = int_to_ptr.vmem [resolvable:$true] %s300_s24 }
  0x5f   :  { %354 = vmatprep.mubr.msk.f32.mxu0 %vm101_vm0, %v88_v5  ;;  %365 = vmatprep.subr.bf16.mxu0 %v364_v3  ;;  %v186_v9 = vld [vmem:[#allocation8 + $0x8] sm:$0xff]  ;;  %v333_v18 = vld [vmem:[#allocation10] ss:$0 sm:$0xff]  ;;  %s503_s12 = scalar_lea.vmem %s301_s24, 256  ;;  %p508_p13 = scmp.lt.s32.totalorder %s301_s24, %s301_s24 }
  0x60   :  { %367 = vmatpush3.bf16.msra.mxu0 %v364_v3  ;;  %v372_v10 = vpack.c.bf16 %v186_v9, %v185_v8  ;;  %p504_p12 = scmp.ne.s32.totalorder %s301_s24, %s503_s12  ;;  %p509_p0 = scmp.lt.s32.totalorder %s503_s12, %s503_s12 }
  0x61   :  { %369 = vmatprep.subr.bf16.mxu0 %v368_v6 }
  0x62   :  { %373 = vmatprep.subr.bf16.mxu1 %v372_v10  ;;  %p510_p1 = por %p509_p0, %p508_p13 }
  0x63   :  { %375 = vmatpush3.bf16.msra.mxu1 %v372_v10 }
  0x64   :  { %371 = vmatpush3.bf16.msra.mxu0 %v368_v6  ;;  %p511_p2 = pnand %p510_p1, %p504_p12 }
  0x67   :  { %355 = vmatmul.mubr.msk.f32.vlgmr.msra.gmra.mrb[0].mxu0 %vm101_vm0, %v89_v7 }
 0x13a   :  { %v356_v12 = vpop.f32.mrb[0].mxu0 }
 0x13b   :  { %v180_v13 = vadd.f32 %v356_v12, %v330_v11  ;;  %v174_v14 = vpop.f32.mrb[1].mxu0 }
 0x13c   :  { %v175_v15 = vadd.f32 %v330_v11, %v174_v14 }
 0x13e   :  { %385 = vtanh.f32 %v175_v15 }
 0x13f   :  { %387 = vtanh.f32 %v180_v13 }
 0x148   :  { %v386_v16 = vpop.eup %385 }
 0x149   :  { %v388_v17 = vpop.eup %387  ;;  %361 = vmatprep.mubr.msk.f32.mxu1 %vm194_vm1, %v386_v16 }
 0x14a   :  { %362 = vmatmul.mubr.msk.f32.vlgmr.msra.gmra.mrb[0].mxu1 %vm194_vm1, %v388_v17 }
 0x21d   :  { %v363_v19 = vpop.f32.mrb[0].mxu1 }
 0x21e   :  { %v273_v20 = vadd.f32 %v363_v19, %v333_v18  ;;  %v267_v21 = vpop.f32.mrb[1].mxu1 }
 0x21f   :  { %v268_v22 = vadd.f32 %v333_v18, %v267_v21 }
 0x220   :  { %278 = vst.msk [vmem:[#allocation11 + $0x8] sm:$0xff] %vm276_vm2, %v273_v20  ;;  %v280_v25 = vmul.f32 %v273_v20, %v273_v20 }
 0x221   :  { %v279_v23 = vmul.f32 %v268_v22, %v268_v22  ;;  %277 = vst.msk [vmem:[#allocation11] sm:$0xff] %vm276_vm2, %v268_v22 }
 0x222   :  { %v284_v26 = vsel %vm276_vm2, %v280_v25, 0.0 }
 0x223   :  { %v281_v24 = vsel %vm276_vm2, %v279_v23, 0.0 }
 0x224   :  { %282 = vadd.xlane.f32.xlu0 %v281_v24 }
 0x228   :  { %285 = vadd.xlane.f32.xlu0 %v284_v26 }
 0x229   :  { %514 = shalt.err (!%p511_p2)
}
 0x22a   :  { %s515_s15 = scalar_lea.hbm %s718_s5, 256 }
 0x22b   :  { %p516_p3 = scmp.ne.s32.totalorder %s718_s5, %s515_s15  ;;  %p519_p4 = scmp.lt.u32.totalorder %s515_s15, %s718_s5 }
 0x22d   :  { %p521_p5 = pnand %p519_p4, %p516_p3 }
 0x22f   :  { %524 = shalt.err (!%p521_p5)
}
 0x230   :  { %306 = dma.vmem_to_hbm [thread:$0]  %s301_s24, 256, %s718_s5, [#allocation4], %s559_s9, %s559_s9, %s560_s10  }
 0x231   :  { %s565_s0 = smov [#allocation12]  }
 0x232   :  { %s312_s21 = sshll.u32 %s565_s0, 4  ;;  %s313_s21 = int_to_ptr.vmem [resolvable:$true] %s312_s21 }
 0x233   :  { %s525_s22 = scalar_lea.vmem %s313_s21, 256  ;;  %p530_p7 = scmp.lt.s32.totalorder %s313_s21, %s313_s21 }
 0x234   :  { %p526_p6 = scmp.ne.s32.totalorder %s313_s21, %s525_s22  ;;  %p531_p8 = scmp.lt.s32.totalorder %s525_s22, %s525_s22 }
 0x236   :  { %p532_p9 = por %p531_p8, %p530_p7 }
 0x238   :  { %p533_p10 = pnand %p532_p9, %p526_p6 }
 0x2b1   :  { %v283_v27 = vpop.xlane.xlu0 %282 }
 0x2b2   :  { %v287_v28 = vmax.f32 %v283_v27, 1e-24 }
 0x2b4   :  { %389 = vrsqrt.f32 %v287_v28 }
 0x2b5   :  { %v286_v29 = vpop.xlane.xlu0 %285 }
 0x2b6   :  { %v288_v30 = vmax.f32 %v286_v29, 1e-24 }
 0x2b8   :  { %391 = vrsqrt.f32 %v288_v30 }
 0x2be   :  { %v390_v31 = vpop.eup %389 }
 0x2bf   :  { %v291_v32 = vmul.f32 %v390_v31, %v268_v22 }
 0x2c1   :  { %293 = vst.msk [vmem:[#allocation12] sm:$0xff] %vm276_vm2, %v291_v32 }
 0x2c2   :  { %v392_v33 = vpop.eup %391 }
 0x2c3   :  { %v292_v34 = vmul.f32 %v392_v33, %v273_v20 }
 0x2c5   :  { %294 = vst.msk [vmem:[#allocation12 + $0x8] sm:$0xff] %vm276_vm2, %v292_v34 }
 0x2c6   :  { %536 = shalt.err (!%p533_p10)
}
 0x2c7   :  { %s537_s25 = scalar_lea.hbm %s719_s6, 256 }
 0x2c8   :  { %p538_p11 = scmp.ne.s32.totalorder %s719_s6, %s537_s25  ;;  %p541_p12 = scmp.lt.u32.totalorder %s537_s25, %s719_s6 }
 0x2ca   :  { %p543_p13 = pnand %p541_p12, %p538_p11 }
 0x2cc   :  { %546 = shalt.err (!%p543_p13)
}
 0x2cd   :  { %318 = dma.vmem_to_hbm [thread:$0]  %s313_s21, 256, %s719_s6, [#allocation13], %s559_s9, %s559_s9, %s560_s10  }
 0x2ce   :  { %553 = dma.done.wait [#allocation4], 256  }
 0x2cf   :  { %554 = vsyncadd [#allocation4], 4294967040 }
 0x2d0   :  { %555 = dma.done.wait [#allocation13], 256  }
 0x2d1   :  { %556 = vsyncadd [#allocation13], 4294967040 }
 0x2d2   :  { %325 = vsyncpa [#allocation3], 1 }
 0x2d3   :  { %326 = vsyncpa [#allocation6], 1 }
 0x2d4   :  { %327 = vsyncpa [#allocation9], 1 }
 0x2d5   :  { %328 = vsyncpa [#allocation4], 1 }
 0x2d6   :  { %329 = vsyncpa [#allocation13], 1 }

</bundles_post_ra>
